<compile_context>
chip_gen: v7x
topology: tpu7x:2x2x1
jax: 0.10.0
libtpu: 0.0.40
codegen_flags: <defaults>
</compile_context>

<pallas_src>
import functools

import jax
import jax.numpy as jnp
from jax import lax
from jax.experimental import pallas as pl
from jax.experimental.pallas import tpu as pltpu


def _round_up(a, b):
    return (a + b - 1) // b * b


def _pack_factor(d):
    """How many logical D-wide rows fit in one 128-lane vector row."""
    return (128 // d) if (d < 128 and 128 % d == 0) else 1


def _mlp_block_kernel(x_ref, w1_ref, b1_ref, w2_ref, b2_ref,
                      gamma_ref, beta_ref, a_ref, o_ref, *, eps):
    """One (tile_m4, Dp) lane-dense slab: MLP + residual + segmented LayerNorm."""
    x = x_ref[...]                                                      # (tm, Dp) f32

    # ---- MLP on MXU: bf16 inputs, f32 accumulation ----
    h = jnp.dot(x.astype(jnp.bfloat16), w1_ref[...],
                preferred_element_type=jnp.float32)                     # (tm, Hp)
    h = jnp.maximum(h + b1_ref[...], 0.0).astype(jnp.bfloat16)          # bias+ReLU, bf16
    y = jnp.dot(h, w2_ref[...], preferred_element_type=jnp.float32)     # (tm, Dp)

    # ---- residual (f32) ----
    r = y + b2_ref[...] + x                                             # (tm, Dp)

    # ---- segmented LayerNorm, lane-dense via the MXU ----
    # a_ref = kron(I_pack, ones(seg,seg)/seg): (r @ a) yields each segment's mean,
    # already broadcast across that segment's lanes.  Entries are exact in bf16
    # for power-of-two seg; f32 accumulation keeps the reduction accurate.
    mean = jnp.dot(r.astype(jnp.bfloat16), a_ref[...],
                   preferred_element_type=jnp.float32)                  # (tm, Dp)
    cent = r - mean
    var = jnp.dot((cent * cent).astype(jnp.bfloat16), a_ref[...],
                  preferred_element_type=jnp.float32)                   # (tm, Dp)
    out = cent * lax.rsqrt(var + eps) * gamma_ref[...] + beta_ref[...]

    # TODO(synk): nn.Dropout is identity in eval mode; training-mode dropout would
    # use pltpu.prng_seed / pltpu.stateful_bernoulli here.
    o_ref[...] = out.astype(o_ref.dtype)


def pack_mlp_block_params(w1, b1, w2, b2, gamma, beta, pack=None):
    """Build the packed / resident kernel parameters ONCE (hoisted off the hot path).

    Weights are quantized to bf16 for the MXU (intentional; f32 accumulation).
    """
    D, H = w1.shape
    if pack is None:
        pack = _pack_factor(D)
    eye = jnp.eye(pack, dtype=jnp.float32)
    w1p = jnp.kron(eye, w1.astype(jnp.float32)).astype(jnp.bfloat16)    # (Dp, Hp)
    w2p = jnp.kron(eye, w2.astype(jnp.float32)).astype(jnp.bfloat16)    # (Hp, Dp)
    b1p = jnp.tile(b1.astype(jnp.float32), pack).reshape(1, H * pack)
    b2p = jnp.tile(b2.astype(jnp.float32), pack).reshape(1, D * pack)
    gammap = jnp.tile(gamma.astype(jnp.float32), pack).reshape(1, D * pack)
    betap = jnp.tile(beta.astype(jnp.float32), pack).reshape(1, D * pack)
    # Segmented-LayerNorm reduction matrix (1/D is an exact bf16 power of two for D=32).
    a = jnp.kron(eye, jnp.full((D, D), 1.0 / D, jnp.float32)).astype(jnp.bfloat16)
    return (w1p, b1p, w2p, b2p, gammap, betap, a)


def mlp_block(x, packed_params, *, eps=1e-5, tile_rows=2048):
    """MLPBlock forward.  x: (batch, seq, dim) f32; packed_params from pack_mlp_block_params."""
    B, S, D = x.shape
    w1p, b1p, w2p, b2p, gammap, betap, a = packed_params
    Dp, Hp = w1p.shape
    pack = Dp // D
    M = B * S
    M4 = pl.cdiv(M, pack)                       # number of packed rows

    # ---- wrapper-side layout plumbing (pure JAX, outside the kernel) ----
    x2 = x.reshape(M, D)
    pad_rows = M4 * pack - M                    # <= pack-1 (<= 3) rows; no tile-multiple pad
    if pad_rows:
        x2 = jnp.pad(x2, ((0, pad_rows), (0, 0)))
    xp = x2.reshape(M4, Dp)                     # `pack` consecutive rows per 128 lanes

    # ---- row tiling of the packed (M4, Dp) slab ----
    if M4 <= 8:
        tile_m4 = max(M4, 1)                    # tiny problem: block == full array
    else:
        tile_m4 = min(int(tile_rows), _round_up(pl.cdiv(M4, 2), 8))
        grid_m = pl.cdiv(M4, tile_m4)
        if grid_m % 2 == 1 and M4 >= 16:
            # Bias toward an even grid so both v7x TensorCores get equal work.
            tile_m4 = _round_up(pl.cdiv(M4, grid_m + 1), 8)
    grid_m = pl.cdiv(M4, tile_m4)               # ragged last block is masked by Pallas

    cost = pl.CostEstimate(
        flops=4 * M4 * Dp * Hp + 4 * M4 * Dp * Dp,   # 2 linears + 2 LN reductions (packed)
        transcendentals=M4 * pack,                   # one rsqrt per logical row
        bytes_accessed=(2 * M4 * Dp * 4              # x in + out (f32)
                        + 2 * Dp * Hp * 2            # w1p + w2p (bf16)
                        + Dp * Dp * 2                # LN reduction matrix (bf16)
                        + 4 * Dp * 4))               # biases + gamma/beta (f32)

    outp = pl.pallas_call(
        functools.partial(_mlp_block_kernel, eps=eps),
        out_shape=jax.ShapeDtypeStruct((M4, Dp), x.dtype),
        grid_spec=pltpu.PrefetchScalarGridSpec(
            num_scalar_prefetch=0,
            grid=(grid_m,),
            in_specs=[
                pl.BlockSpec((tile_m4, Dp), lambda i: (i, 0)),   # packed x rows
                pl.BlockSpec((Dp, Hp), lambda i: (0, 0)),        # W1 block-diag (resident)
                pl.BlockSpec((1, Hp), lambda i: (0, 0)),         # b1 (tiled)
                pl.BlockSpec((Hp, Dp), lambda i: (0, 0)),        # W2 block-diag (resident)
                pl.BlockSpec((1, Dp), lambda i: (0, 0)),         # b2 (tiled)
                pl.BlockSpec((1, Dp), lambda i: (0, 0)),         # LayerNorm gamma (tiled)
                pl.BlockSpec((1, Dp), lambda i: (0, 0)),         # LayerNorm beta (tiled)
                pl.BlockSpec((Dp, Dp), lambda i: (0, 0)),        # LN reduction matrix
            ],
            out_specs=pl.BlockSpec((tile_m4, Dp), lambda i: (i, 0)),
        ),
        compiler_params=pltpu.CompilerParams(
            dimension_semantics=("parallel",),
            # v5e scoped-VMEM default is only 16 MiB; raise explicitly for the
            # larger tiles, staying well under v7x's 64 MiB physical VMEM.
            vmem_limit_bytes=48 * 1024 * 1024),
        cost_estimate=cost,
    )(xp, w1p, b1p, w2p, b2p, gammap, betap, a)

    out2 = outp.reshape(M4 * pack, D)
    if pad_rows:
        out2 = out2[:M]
    return out2.reshape(B, S, D)


def _reference(x, w1, b1, w2, b2, gamma, beta, eps=1e-5):
    h = jnp.maximum(x @ w1 + b1, 0.0)
    y = h @ w2 + b2
    r = y + x
    mean = jnp.mean(r, axis=-1, keepdims=True)
    var = jnp.mean((r - mean) ** 2, axis=-1, keepdims=True)
    return (r - mean) / jnp.sqrt(var + eps) * gamma + beta


if __name__ == "__main__":
    # Module config: input_dim == embed_dim == 32, mlp_embed_factor = 4,
    # nonlin_func = ReLU, pdropout (identity in eval).
    batch, seq, embed_dim, mlp_embed_factor = 2, 8, 32, 4
    hidden = embed_dim * mlp_embed_factor

    key = jax.random.PRNGKey(0)
    kx, k1, k2, k3, k4 = jax.random.split(key, 5)

    x = jax.random.normal(kx, (batch, seq, embed_dim), dtype=jnp.float32)

    # Deterministic synthetic parameters (PyTorch-like small uniform init).
    lim1 = 1.0 / jnp.sqrt(embed_dim)
    lim2 = 1.0 / jnp.sqrt(hidden)
    w1 = jax.random.uniform(k1, (embed_dim, hidden), jnp.float32, -lim1, lim1)
    b1 = jax.random.uniform(k2, (hidden,), jnp.float32, -lim1, lim1)
    w2 = jax.random.uniform(k3, (hidden, embed_dim), jnp.float32, -lim2, lim2)
    b2 = jax.random.uniform(k4, (embed_dim,), jnp.float32, -lim2, lim2)
    gamma = jnp.ones((embed_dim,), jnp.float32)
    beta = jnp.zeros((embed_dim,), jnp.float32)

    # Packed / resident parameters are built once and reused across forward calls.
    packed = pack_mlp_block_params(w1, b1, w2, b2, gamma, beta)

    out = mlp_block(x, packed)
    out = jax.block_until_ready(out)

    ref = _reference(x, w1, b1, w2, b2, gamma, beta)
    assert out.shape == (batch, seq, embed_dim)
    # bf16 MXU inputs (f32 accumulation) -> relaxed tolerance vs the all-f32 reference.
    assert jnp.allclose(out, ref, atol=2e-2, rtol=2e-2), "mismatch vs reference"

    print("KERNEL_OK")
</pallas_src>

<mosaic_0001>
module attributes {stable_mosaic.version = 11 : i64} {
  func.func @_mlp_block_kernel(%arg0: i32, %arg1: memref<4x128xf32, #tpu.memory_space<vmem>>, %arg2: memref<128x512xbf16, #tpu.memory_space<vmem>>, %arg3: memref<1x512xf32, #tpu.memory_space<vmem>>, %arg4: memref<512x128xbf16, #tpu.memory_space<vmem>>, %arg5: memref<1x128xf32, #tpu.memory_space<vmem>>, %arg6: memref<1x128xf32, #tpu.memory_space<vmem>>, %arg7: memref<1x128xf32, #tpu.memory_space<vmem>>, %arg8: memref<128x128xbf16, #tpu.memory_space<vmem>>, %arg9: memref<4x128xf32, #tpu.memory_space<vmem>>) attributes {dimension_semantics = [#tpu.dimension_semantics<parallel>], iteration_bounds = array<i64: 1>, scalar_prefetch = 0 : i64, scratch_operands = 0 : i64, tpu.core_type = #tpu.core_type<tc>, window_params = [{transform_indices = @transform_0, window_bounds = array<i64: 4, 128>}, {pipeline_mode = #tpu.pipeline_mode<synchronous>, transform_indices = @transform_1, window_bounds = array<i64: 128, 512>}, {pipeline_mode = #tpu.pipeline_mode<synchronous>, transform_indices = @transform_2, window_bounds = array<i64: 1, 512>}, {pipeline_mode = #tpu.pipeline_mode<synchronous>, transform_indices = @transform_3, window_bounds = array<i64: 512, 128>}, {pipeline_mode = #tpu.pipeline_mode<synchronous>, transform_indices = @transform_4, window_bounds = array<i64: 1, 128>}, {pipeline_mode = #tpu.pipeline_mode<synchronous>, transform_indices = @transform_5, window_bounds = array<i64: 1, 128>}, {pipeline_mode = #tpu.pipeline_mode<synchronous>, transform_indices = @transform_6, window_bounds = array<i64: 1, 128>}, {pipeline_mode = #tpu.pipeline_mode<synchronous>, transform_indices = @transform_7, window_bounds = array<i64: 128, 128>}, {transform_indices = @transform_8, window_bounds = array<i64: 4, 128>}]} {
    %c0 = arith.constant 0 : index
    %c0_0 = arith.constant 0 : index
    %0 = vector.load %arg1[%c0, %c0_0] : memref<4x128xf32, #tpu.memory_space<vmem>>, vector<4x128xf32>
    %1 = arith.truncf %0 : vector<4x128xf32> to vector<4x128xbf16>
    %c0_1 = arith.constant 0 : index
    %c0_2 = arith.constant 0 : index
    %2 = vector.load %arg2[%c0_1, %c0_2] : memref<128x512xbf16, #tpu.memory_space<vmem>>, vector<128x512xbf16>
    %cst = arith.constant dense<0.000000e+00> : vector<4x512xf32>
    %3 = tpu.matmul %1, %2, %cst {dimension_numbers = #tpu.dot_dimension_numbers<[1], [0], [0], [1], [0, 0, 1, 1], [], []>} : vector<4x128xbf16>, vector<128x512xbf16>, vector<4x512xf32> -> vector<4x512xf32>
    %c0_3 = arith.constant 0 : index
    %c0_4 = arith.constant 0 : index
    %4 = vector.load %arg3[%c0_3, %c0_4] : memref<1x512xf32, #tpu.memory_space<vmem>>, vector<1x512xf32>
    %5 = vector.broadcast %4 : vector<1x512xf32> to vector<4x512xf32>
    %6 = arith.addf %3, %5 : vector<4x512xf32>
    %cst_5 = arith.constant 0.000000e+00 : f32
    %7 = vector.broadcast %cst_5 : f32 to vector<4x512xf32>
    %8 = arith.maximumf %6, %7 : vector<4x512xf32>
    %9 = arith.truncf %8 : vector<4x512xf32> to vector<4x512xbf16>
    %c0_6 = arith.constant 0 : index
    %c0_7 = arith.constant 0 : index
    %10 = vector.load %arg4[%c0_6, %c0_7] : memref<512x128xbf16, #tpu.memory_space<vmem>>, vector<512x128xbf16>
    %cst_8 = arith.constant dense<0.000000e+00> : vector<4x128xf32>
    %11 = tpu.matmul %9, %10, %cst_8 {dimension_numbers = #tpu.dot_dimension_numbers<[1], [0], [0], [1], [0, 0, 1, 1], [], []>} : vector<4x512xbf16>, vector<512x128xbf16>, vector<4x128xf32> -> vector<4x128xf32>
    %c0_9 = arith.constant 0 : index
    %c0_10 = arith.constant 0 : index
    %12 = vector.load %arg5[%c0_9, %c0_10] : memref<1x128xf32, #tpu.memory_space<vmem>>, vector<1x128xf32>
    %13 = vector.broadcast %12 : vector<1x128xf32> to vector<4x128xf32>
    %14 = arith.addf %11, %13 : vector<4x128xf32>
    %15 = arith.addf %14, %0 : vector<4x128xf32>
    %16 = arith.truncf %15 : vector<4x128xf32> to vector<4x128xbf16>
    %c0_11 = arith.constant 0 : index
    %c0_12 = arith.constant 0 : index
    %17 = vector.load %arg8[%c0_11, %c0_12] : memref<128x128xbf16, #tpu.memory_space<vmem>>, vector<128x128xbf16>
    %cst_13 = arith.constant dense<0.000000e+00> : vector<4x128xf32>
    %18 = tpu.matmul %16, %17, %cst_13 {dimension_numbers = #tpu.dot_dimension_numbers<[1], [0], [0], [1], [0, 0, 1, 1], [], []>} : vector<4x128xbf16>, vector<128x128xbf16>, vector<4x128xf32> -> vector<4x128xf32>
    %19 = arith.subf %15, %18 : vector<4x128xf32>
    %20 = arith.mulf %19, %19 : vector<4x128xf32>
    %21 = arith.truncf %20 : vector<4x128xf32> to vector<4x128xbf16>
    %c0_14 = arith.constant 0 : index
    %c0_15 = arith.constant 0 : index
    %22 = vector.load %arg8[%c0_14, %c0_15] : memref<128x128xbf16, #tpu.memory_space<vmem>>, vector<128x128xbf16>
    %cst_16 = arith.constant dense<0.000000e+00> : vector<4x128xf32>
    %23 = tpu.matmul %21, %22, %cst_16 {dimension_numbers = #tpu.dot_dimension_numbers<[1], [0], [0], [1], [0, 0, 1, 1], [], []>} : vector<4x128xbf16>, vector<128x128xbf16>, vector<4x128xf32> -> vector<4x128xf32>
    %cst_17 = arith.constant 9.99999974E-6 : f32
    %24 = vector.broadcast %cst_17 : f32 to vector<4x128xf32>
    %25 = arith.addf %23, %24 : vector<4x128xf32>
    %26 = math.rsqrt %25 : vector<4x128xf32>
    %27 = arith.mulf %19, %26 : vector<4x128xf32>
    %c0_18 = arith.constant 0 : index
    %c0_19 = arith.constant 0 : index
    %28 = vector.load %arg6[%c0_18, %c0_19] : memref<1x128xf32, #tpu.memory_space<vmem>>, vector<1x128xf32>
    %29 = vector.broadcast %28 : vector<1x128xf32> to vector<4x128xf32>
    %30 = arith.mulf %27, %29 : vector<4x128xf32>
    %c0_20 = arith.constant 0 : index
    %c0_21 = arith.constant 0 : index
    %31 = vector.load %arg7[%c0_20, %c0_21] : memref<1x128xf32, #tpu.memory_space<vmem>>, vector<1x128xf32>
    %32 = vector.broadcast %31 : vector<1x128xf32> to vector<4x128xf32>
    %33 = arith.addf %30, %32 : vector<4x128xf32>
    %c0_22 = arith.constant 0 : index
    %c0_23 = arith.constant 0 : index
    %34 = vector.load %arg9[%c0_22, %c0_23] : memref<4x128xf32, #tpu.memory_space<vmem>>, vector<4x128xf32>
    tpu.vector_store %arg9[%c0_22, %c0_23], %33 {strides = array<i32>} : memref<4x128xf32, #tpu.memory_space<vmem>>, vector<4x128xf32>,
    return
  }
  func.func @transform_0(%arg0: i32) -> (i32, i32) {
    %c0_i32 = arith.constant 0 : i32
    %c0_i32_0 = arith.constant 0 : i32
    return %arg0, %c0_i32 : i32, i32
  }
  func.func @transform_1(%arg0: i32) -> (i32, i32) {
    %c0_i32 = arith.constant 0 : i32
    %c0_i32_0 = arith.constant 0 : i32
    %c0_i32_1 = arith.constant 0 : i32
    return %c0_i32, %c0_i32_0 : i32, i32
  }
  func.func @transform_2(%arg0: i32) -> (i32, i32) {
    %c0_i32 = arith.constant 0 : i32
    %c0_i32_0 = arith.constant 0 : i32
    %c0_i32_1 = arith.constant 0 : i32
    return %c0_i32, %c0_i32_0 : i32, i32
  }
  func.func @transform_3(%arg0: i32) -> (i32, i32) {
    %c0_i32 = arith.constant 0 : i32
    %c0_i32_0 = arith.constant 0 : i32
    %c0_i32_1 = arith.constant 0 : i32
    return %c0_i32, %c0_i32_0 : i32, i32
  }
  func.func @transform_4(%arg0: i32) -> (i32, i32) {
    %c0_i32 = arith.constant 0 : i32
    %c0_i32_0 = arith.constant 0 : i32
    %c0_i32_1 = arith.constant 0 : i32
    return %c0_i32, %c0_i32_0 : i32, i32
  }
  func.func @transform_5(%arg0: i32) -> (i32, i32) {
    %c0_i32 = arith.constant 0 : i32
    %c0_i32_0 = arith.constant 0 : i32
    %c0_i32_1 = arith.constant 0 : i32
    return %c0_i32, %c0_i32_0 : i32, i32
  }
  func.func @transform_6(%arg0: i32) -> (i32, i32) {
    %c0_i32 = arith.constant 0 : i32
    %c0_i32_0 = arith.constant 0 : i32
    %c0_i32_1 = arith.constant 0 : i32
    return %c0_i32, %c0_i32_0 : i32, i32
  }
  func.func @transform_7(%arg0: i32) -> (i32, i32) {
    %c0_i32 = arith.constant 0 : i32
    %c0_i32_0 = arith.constant 0 : i32
    %c0_i32_1 = arith.constant 0 : i32
    return %c0_i32, %c0_i32_0 : i32, i32
  }
  func.func @transform_8(%arg0: i32) -> (i32, i32) {
    %c0_i32 = arith.constant 0 : i32
    %c0_i32_0 = arith.constant 0 : i32
    return %arg0, %c0_i32 : i32, i32
  }
}

</mosaic_0001>

<bundles_post_ra>
// kernel: tpu_custom_call.1
= control target key start
LH: loop header
LB: loop body
LE: loop exit
PB: predicated region body
PF: predicated region fallthrough
CT: control target
= control target key end

     0   :  { %13 = vsyncpa [#allocation3], 0  ;;  %s1467_s0 = inlined_call_operand.hbm [shape: f32[4,128], index: 0, kind: input, shape index: {}]   ;;  %s1468_s1 = inlined_call_operand.hbm [shape: bf16[128,512], index: 1, kind: input, shape index: {}]   ;;  %s1469_s2 = inlined_call_operand.vmem [shape: f32[1,512], index: 2, kind: input, shape index: {}]   ;;  %s1470_s3 = inlined_call_operand.hbm [shape: bf16[512,128], index: 3, kind: input, shape index: {}]   ;;  %s1471_s4 = inlined_call_operand.vmem [shape: f32[1,128], index: 4, kind: input, shape index: {}]   ;;  %s1472_s5 = inlined_call_operand.vmem [shape: f32[1,128], index: 5, kind: input, shape index: {}]   ;;  %s1473_s6 = inlined_call_operand.vmem [shape: f32[1,128], index: 6, kind: input, shape index: {}]   ;;  %s1474_s7 = inlined_call_operand.hbm [shape: bf16[128,128], index: 7, kind: input, shape index: {}]   ;;  %s1475_s8 = inlined_call_operand.hbm [shape: f32[4,128], index: 8, kind: output, shape index: {}]  }
   0x1   :  { %14 = vsyncpa [#allocation6], 0 }
   0x2   :  { %15 = vsyncpa [#allocation9], 0 }
   0x3   :  { %16 = vsyncpa [#allocation4], 0  ;;  %s1315_s27 = smov [#allocation5]   ;;  %s1197_s9 = scalar_lea.hbm %s1468_s1, 4096 }
   0x4   :  { %s32_s28 = sshll.u32 %s1315_s27, 4  ;;  %p1198_p0 = scmp.ne.s32.totalorder %s1468_s1, %s1197_s9  ;;  %s33_s28 = int_to_ptr.vmem [resolvable:$true] %s32_s28 }
   0x5   :  { %p1201_p1 = scmp.lt.u32.totalorder %s1197_s9, %s1468_s1 }
   0x7   :  { %p1203_p2 = pnand %p1201_p1, %p1198_p0 }
   0x9   :  { %1206 = shalt.err (!%p1203_p2)
}
   0xa   :  { %s1207_s14 = scalar_lea.vmem %s33_s28, 4096  ;;  %p1212_p4 = scmp.lt.s32.totalorder %s33_s28, %s33_s28 }
   0xb   :  { %p1208_p3 = scmp.ne.s32.totalorder %s33_s28, %s1207_s14  ;;  %p1213_p5 = scmp.lt.s32.totalorder %s1207_s14, %s1207_s14 }
   0xd   :  { %p1214_p6 = por %p1213_p5, %p1212_p4 }
   0xf   :  { %p1215_p7 = pnand %p1214_p6, %p1208_p3 }
  0x11   :  { %1218 = shalt.err (!%p1215_p7)
}
  0x12   :  { %s1316_s15 = smov 256   ;;  %s1317_s16 = smov 16  }
  0x13   :  { %38 = dma.hbm_to_vmem [thread:$0]  %s1468_s1, 4096, %s33_s28, [#allocation6], %s1316_s15, %s1316_s15, %s1317_s16  }
  0x14   :  { %s1318_s19 = smov [#allocation2]   ;;  %s1319_s21 = smov [#allocation7]  }
  0x15   :  { %s23_s20 = sshll.u32 %s1318_s19, 4  ;;  %s46_s22 = sshll.u32 %s1319_s21, 4  ;;  %s24_s20 = int_to_ptr.vmem [resolvable:$true] %s23_s20  ;;  %s47_s22 = int_to_ptr.vmem [resolvable:$true] %s46_s22 }
  0x16   :  { %s1219_s25 = scalar_lea.hbm %s1467_s0, 64 }
  0x17   :  { %p1220_p8 = scmp.ne.s32.totalorder %s1467_s0, %s1219_s25  ;;  %p1223_p9 = scmp.lt.u32.totalorder %s1219_s25, %s1467_s0 }
  0x19   :  { %p1225_p10 = pnand %p1223_p9, %p1220_p8 }
  0x1b   :  { %1228 = shalt.err (!%p1225_p10)
}
  0x1c   :  { %s1229_s1 = scalar_lea.vmem %s24_s20, 64  ;;  %p1234_p12 = scmp.lt.s32.totalorder %s24_s20, %s24_s20 }
  0x1d   :  { %p1230_p11 = scmp.ne.s32.totalorder %s24_s20, %s1229_s1  ;;  %p1235_p13 = scmp.lt.s32.totalorder %s1229_s1, %s1229_s1 }
  0x1f   :  { %p1236_p0 = por %p1235_p13, %p1234_p12 }
  0x21   :  { %p1237_p1 = pnand %p1236_p0, %p1230_p11 }
  0x23   :  { %1240 = shalt.err (!%p1237_p1)
}
  0x24   :  { %26 = dma.hbm_to_vmem [thread:$0]  %s1467_s0, 64, %s24_s20, [#allocation3]  }
  0x25   :  { %s1241_s12 = scalar_lea.hbm %s1470_s3, 4096 }
  0x26   :  { %p1242_p2 = scmp.ne.s32.totalorder %s1470_s3, %s1241_s12  ;;  %p1245_p3 = scmp.lt.u32.totalorder %s1241_s12, %s1470_s3 }
  0x28   :  { %p1247_p4 = pnand %p1245_p3, %p1242_p2 }
  0x2a   :  { %1250 = shalt.err (!%p1247_p4)
}
  0x2b   :  { %s1251_s17 = scalar_lea.vmem %s47_s22, 4096  ;;  %p1256_p6 = scmp.lt.s32.totalorder %s47_s22, %s47_s22 }
  0x2c   :  { %p1252_p5 = scmp.ne.s32.totalorder %s47_s22, %s1251_s17  ;;  %p1257_p7 = scmp.lt.s32.totalorder %s1251_s17, %s1251_s17 }
  0x2e   :  { %p1258_p8 = por %p1257_p7, %p1256_p6 }
  0x30   :  { %p1259_p9 = pnand %p1258_p8, %p1252_p5 }
  0x32   :  { %1262 = shalt.err (!%p1259_p9)
}
  0x33   :  { %s1320_s0 = smov 64   ;;  %s1321_s18 = smov 4  }
  0x34   :  { %52 = dma.hbm_to_vmem [thread:$0]  %s1470_s3, 4096, %s47_s22, [#allocation6], %s1320_s0, %s1320_s0, %s1321_s18  }
  0x35   :  { %s1322_s21 = smov [#allocation8]   ;;  %s1263_s26 = scalar_lea.hbm %s1474_s7, 1024 }
  0x36   :  { %s64_s23 = sshll.u32 %s1322_s21, 4  ;;  %p1264_p10 = scmp.ne.s32.totalorder %s1474_s7, %s1263_s26  ;;  %s65_s23 = int_to_ptr.vmem [resolvable:$true] %s64_s23 }
  0x37   :  { %p1267_p11 = scmp.lt.u32.totalorder %s1263_s26, %s1474_s7 }
  0x39   :  { %p1269_p12 = pnand %p1267_p11, %p1264_p10 }
  0x3b   :  { %1272 = shalt.err (!%p1269_p12)
}
  0x3c   :  { %s1273_s28 = scalar_lea.vmem %s65_s23, 1024  ;;  %p1278_p0 = scmp.lt.s32.totalorder %s65_s23, %s65_s23 }
  0x3d   :  { %p1274_p13 = scmp.ne.s32.totalorder %s65_s23, %s1273_s28  ;;  %p1279_p1 = scmp.lt.s32.totalorder %s1273_s28, %s1273_s28 }
  0x3f   :  { %p1280_p2 = por %p1279_p1, %p1278_p0 }
  0x41   :  { %p1281_p3 = pnand %p1280_p2, %p1274_p13 }
  0x43   :  { %1284 = shalt.err (!%p1281_p3)
}
  0x44   :  { %70 = dma.hbm_to_vmem [thread:$0]  %s1474_s7, 1024, %s65_s23, [#allocation9], %s1320_s0, %s1320_s0, %s1321_s18  }
  0x45   :  { %1307 = dma.done.wait [#allocation3], 64  }
  0x46   :  { %1308 = vsyncadd [#allocation3], 4294967232 }
  0x47   :  { %1309 = dma.done.wait [#allocation6], 8192  }
  0x48   :  { %1310 = vsyncadd [#allocation6], 4294959104 }
  0x49   :  { %1311 = dma.done.wait [#allocation9], 1024  }
  0x4a   :  { %1312 = vsyncadd [#allocation9], 4294966272  ;;  %v1323_v0 = vmov 0   ;;  %v1107_v1 = vld [vmem:[#allocation5 + $0x4] ss:$16 sps:$4 sm:$0xff]   ;;  %v1159_v39 = vld [vmem:[#allocation7 + $0x48] sm:$0xff]  }
  0x4b   :  { %332 = vmatprep.mubr.bf16.mxu0 %v1323_v0  ;;  %373 = vmatprep.mubr.bf16.mxu1 %v1323_v0  ;;  %v1109_v2 = vld [vmem:[#allocation5 + $0xc] ss:$16 sps:$4 sm:$0xff]   ;;  %v1111_v3 = vld [vmem:[#allocation5] ss:$16 sps:$4 sm:$0xff]   ;;  %v1112_v4 = vld [vmem:[#allocation5 + $0x8] ss:$16 sps:$4 sm:$0xff]  }
  0x4c   :  { %300 = vmatprep.subr.bf16.mxu0 %v1107_v1  ;;  %341 = vmatprep.subr.bf16.mxu1 %v1109_v2  ;;  %v1113_v5 = vld [vmem:[#allocation5 + $0x24] ss:$16 sps:$4 sm:$0xff]   ;;  %v1115_v6 = vld [vmem:[#allocation5 + $0x2c] ss:$16 sps:$4 sm:$0xff]   ;;  %v1117_v7 = vld [vmem:[#allocation5 + $0x20] ss:$16 sps:$4 sm:$0xff]  }
  0x4d   :  { %301 = vmatpush1.bf16.msra.mxu0 %v1111_v3  ;;  %342 = vmatpush1.bf16.msra.mxu1 %v1112_v4  ;;  %v1118_v8 = vld [vmem:[#allocation5 + $0x28] ss:$16 sps:$4 sm:$0xff]   ;;  %v1119_v9 = vld [vmem:[#allocation5 + $0x44] ss:$16 sps:$4 sm:$0xff]   ;;  %v1121_v10 = vld [vmem:[#allocation5 + $0x4c] ss:$16 sps:$4 sm:$0xff]   ;;  %v120_v4 = vlaneseq }
  0x4e   :  { %302 = vmatprep.subr.bf16.mxu0 %v1113_v5  ;;  %343 = vmatprep.subr.bf16.mxu1 %v1115_v6  ;;  %v1123_v11 = vld [vmem:[#allocation5 + $0x40] ss:$16 sps:$4 sm:$0xff]   ;;  %v1124_v12 = vld [vmem:[#allocation5 + $0x48] ss:$16 sps:$4 sm:$0xff]   ;;  %v1125_v13 = vld [vmem:[#allocation5 + $0x64] ss:$16 sps:$4 sm:$0xff]  }
  0x4f   :  { %v1127_v14 = vld [vmem:[#allocation5 + $0x6c] ss:$16 sps:$4 sm:$0xff]   ;;  %v1129_v15 = vld [vmem:[#allocation5 + $0x60] ss:$16 sps:$4 sm:$0xff]   ;;  %v1130_v16 = vld [vmem:[#allocation5 + $0x68] ss:$16 sps:$4 sm:$0xff]  }
  0x50   :  { %v1131_v17 = vld [vmem:[#allocation5 + $0x84] ss:$16 sps:$4 sm:$0xff]   ;;  %v1133_v18 = vld [vmem:[#allocation5 + $0x8c] ss:$16 sps:$4 sm:$0xff]   ;;  %v1135_v19 = vld [vmem:[#allocation5 + $0x80] ss:$16 sps:$4 sm:$0xff]  }
  0x51   :  { %303 = vmatpush1.bf16.msra.mxu0 %v1117_v7  ;;  %344 = vmatpush1.bf16.msra.mxu1 %v1118_v8  ;;  %v1136_v20 = vld [vmem:[#allocation5 + $0x88] ss:$16 sps:$4 sm:$0xff]   ;;  %v1137_v21 = vld [vmem:[#allocation5 + $0xa4] ss:$16 sps:$4 sm:$0xff]   ;;  %v1139_v22 = vld [vmem:[#allocation5 + $0xac] ss:$16 sps:$4 sm:$0xff]  }
  0x52   :  { %304 = vmatprep.subr.bf16.mxu0 %v1119_v9  ;;  %345 = vmatprep.subr.bf16.mxu1 %v1121_v10  ;;  %v1141_v23 = vld [vmem:[#allocation5 + $0xa0] ss:$16 sps:$4 sm:$0xff]   ;;  %v1142_v24 = vld [vmem:[#allocation5 + $0xa8] ss:$16 sps:$4 sm:$0xff]   ;;  %v1143_v25 = vld [vmem:[#allocation5 + $0xc4] ss:$16 sps:$4 sm:$0xff]  }
  0x53   :  { %v1145_v26 = vld [vmem:[#allocation5 + $0xcc] ss:$16 sps:$4 sm:$0xff]   ;;  %v1147_v27 = vld [vmem:[#allocation5 + $0xc0] ss:$16 sps:$4 sm:$0xff]   ;;  %v1148_v28 = vld [vmem:[#allocation5 + $0xc8] ss:$16 sps:$4 sm:$0xff]  }
  0x54   :  { %v1149_v29 = vld [vmem:[#allocation5 + $0xe4] ss:$16 sps:$4 sm:$0xff]   ;;  %v1151_v30 = vld [vmem:[#allocation5 + $0xec] ss:$16 sps:$4 sm:$0xff]   ;;  %v1153_v31 = vld [vmem:[#allocation5 + $0xe0] ss:$16 sps:$4 sm:$0xff]  }
  0x55   :  { %305 = vmatpush1.bf16.msra.mxu0 %v1123_v11  ;;  %346 = vmatpush1.bf16.msra.mxu1 %v1124_v12  ;;  %v1154_v32 = vld [vmem:[#allocation5 + $0xe8] ss:$16 sps:$4 sm:$0xff]   ;;  %v1420_v33 = vld [vmem:[#allocation2] sm:$0xf]  ;;  %v1155_v34 = vld [vmem:[#allocation7 + $0x40] sm:$0xff]   ;;  %v1324_v3 = vmov 0.0  }
  0x56   :  { %306 = vmatprep.subr.bf16.mxu0 %v1125_v13  ;;  %347 = vmatprep.subr.bf16.mxu1 %v1127_v14  ;;  %v1156_v35 = vld [vmem:[#allocation7 + $0xc0] sm:$0xff]   ;;  %v85_v37 = vpack.c.bf16 %v1420_v33, %v1420_v33  ;;  %v1160_v40 = vld [vmem:[#allocation7 + $0xc8] sm:$0xff]   ;;  %v1163_v43 = vld [vmem:[#allocation7 + $0x50] sm:$0xff]   ;;  %v121_v5 = vshrl.u32 %v120_v4, 7  ;;  %vm1325_vm0 = vmmov 0   ;;  %s1326_s14 = smov [#allocation10]  }
  0x57   :  { %v1157_v36 = vld [vmem:[#allocation7] sm:$0xff]   ;;  %v1161_v41 = vld [vmem:[#allocation7 + $0x8] sm:$0xff]   ;;  %v1164_v44 = vld [vmem:[#allocation7 + $0xd0] sm:$0xff]   ;;  %s907_s15 = sshll.u32 %s1326_s14, 4  ;;  %s908_s15 = int_to_ptr.vmem [resolvable:$true] %s907_s15 }
  0x58   :  { %v1158_v38 = vld [vmem:[#allocation7 + $0x80] sm:$0xff]   ;;  %v1162_v42 = vld [vmem:[#allocation7 + $0x88] sm:$0xff]   ;;  %v1165_v45 = vld [vmem:[#allocation7 + $0x10] sm:$0xff]   ;;  %v122_v6 = vsub.s32 0, %v121_v5  ;;  %v130_v7 = vsub.s32 2, %v121_v5  ;;  %v126_v9 = vsub.s32 1, %v121_v5  ;;  %p1290_p5 = scmp.lt.s32.totalorder %s908_s15, %s908_s15 }
  0x59   :  { %307 = vmatpush1.bf16.msra.mxu0 %v1129_v15  ;;  %348 = vmatpush1.bf16.msra.mxu1 %v1130_v16  ;;  %v1166_v46 = vld [vmem:[#allocation7 + $0x90] sm:$0xff]   ;;  %v1167_v47 = vld [vmem:[#allocation7 + $0x58] sm:$0xff]   ;;  %v1171_v51 = vld [vmem:[#allocation7 + $0x60] sm:$0xff]   ;;  %v134_v10 = vsub.s32 3, %v121_v5  ;;  %s1285_s16 = scalar_lea.vmem %s908_s15, 64 }
  0x5a   :  { %308 = vmatprep.subr.bf16.mxu0 %v1131_v17  ;;  %349 = vmatprep.subr.bf16.mxu1 %v1133_v18  ;;  %v1168_v48 = vld [vmem:[#allocation7 + $0xd8] sm:$0xff]   ;;  %v1172_v52 = vld [vmem:[#allocation7 + $0xe0] sm:$0xff]   ;;  %v1175_v55 = vld [vmem:[#allocation7 + $0x68] sm:$0xff]   ;;  %p1286_p4 = scmp.ne.s32.totalorder %s908_s15, %s1285_s16  ;;  %p1291_p6 = scmp.lt.s32.totalorder %s1285_s16, %s1285_s16 }
  0x5b   :  { %v1169_v49 = vld [vmem:[#allocation7 + $0x18] sm:$0xff]   ;;  %v1173_v53 = vld [vmem:[#allocation7 + $0x20] sm:$0xff]   ;;  %v1176_v56 = vld [vmem:[#allocation7 + $0xe8] sm:$0xff]  }
  0x5c   :  { %v1170_v50 = vld [vmem:[#allocation7 + $0x98] sm:$0xff]   ;;  %v1174_v54 = vld [vmem:[#allocation7 + $0xa0] sm:$0xff]   ;;  %v1177_v57 = vld [vmem:[#allocation7 + $0x28] sm:$0xff]   ;;  %p1292_p7 = por %p1291_p6, %p1290_p5 }
  0x5d   :  { %309 = vmatpush1.bf16.msra.mxu0 %v1135_v19  ;;  %350 = vmatpush1.bf16.msra.mxu1 %v1136_v20  ;;  %v1178_v58 = vld [vmem:[#allocation7 + $0xa8] sm:$0xff]   ;;  %v1179_v59 = vld [vmem:[#allocation7 + $0x70] sm:$0xff]   ;;  %v1183_v63 = vld [vmem:[#allocation7 + $0x78] sm:$0xff]  }
  0x5e   :  { %310 = vmatprep.subr.bf16.mxu0 %v1137_v21  ;;  %351 = vmatprep.subr.bf16.mxu1 %v1139_v22  ;;  %v1180_v60 = vld [vmem:[#allocation7 + $0xf0] sm:$0xff]   ;;  %v1184_v0 = vld [vmem:[#allocation7 + $0xf8] sm:$0xff]   ;;  %p1293_p8 = pnand %p1292_p7, %p1286_p4 }
  0x5f   :  { %v1181_v61 = vld [vmem:[#allocation7 + $0x30] sm:$0xff]   ;;  %v1185_v1 = vld [vmem:[#allocation7 + $0x38] sm:$0xff]  }
  0x60   :  { %v1182_v62 = vld [vmem:[#allocation7 + $0xb0] sm:$0xff]   ;;  %v1186_v2 = vld [vmem:[#allocation7 + $0xb8] sm:$0xff]  }
  0x61   :  { %311 = vmatpush1.bf16.msra.mxu0 %v1141_v23  ;;  %352 = vmatpush1.bf16.msra.mxu1 %v1142_v24  ;;  %v118_v8 = vld [vmem:[%s1469_s2] sm:$0xf] }
  0x62   :  { %312 = vmatprep.subr.bf16.mxu0 %v1143_v25  ;;  %353 = vmatprep.subr.bf16.mxu1 %v1145_v26  ;;  %v123_v11 = vrot.slane %v118_v8, %v122_v6  ;;  %v131_v12 = vrot.slane %v118_v8, %v130_v7  ;;  %v127_v13 = vrot.slane %v118_v8, %v126_v9  ;;  %v992_v9 = vld [vmem:[%s1473_s6] ss:$0 sm:$0xff] }
  0x63   :  { %v135_v14 = vrot.slane %v118_v8, %v134_v10 }
  0x65   :  { %313 = vmatpush1.bf16.msra.mxu0 %v1147_v27  ;;  %354 = vmatpush1.bf16.msra.mxu1 %v1148_v28 }
  0x66   :  { %314 = vmatprep.subr.bf16.mxu0 %v1149_v29  ;;  %355 = vmatprep.subr.bf16.mxu1 %v1151_v30 }
  0x69   :  { %315 = vmatpush1.bf16.msra.mxu0 %v1153_v31  ;;  %356 = vmatpush1.bf16.msra.mxu1 %v1154_v32 }
  0x6a   :  { %993 = vmatprep.subr.bf16.mxu0 %v1155_v34  ;;  %1015 = vmatprep.subr.bf16.mxu1 %v1156_v35  ;;  %v1187_v35 = vld [vmem:[#allocation8] sm:$0xff]  }
  0x6c   :  { %333 = vmatmul.mubr.bf16.vlgmr.msra.gmra.mrb[0].mxu0 %v85_v37  ;;  %374 = vmatmul.mubr.bf16.vlgmr.msra.gmra.mrb[0].mxu1 %v85_v37  ;;  %v1188_v37 = vld [vmem:[#allocation8 + $0x8] sm:$0xff]  }
  0x6d   :  { %994 = vmatpush3.bf16.msra.mxu0 %v1157_v36  ;;  %1016 = vmatpush3.bf16.msra.mxu1 %v1158_v38  ;;  %v1189_v38 = vld [vmem:[#allocation8 + $0x10] sm:$0xff]  }
  0x6e   :  { %995 = vmatprep.subr.bf16.mxu0 %v1159_v39  ;;  %1017 = vmatprep.subr.bf16.mxu1 %v1160_v40  ;;  %v1190_v39 = vld [vmem:[#allocation8 + $0x18] sm:$0xff]   ;;  %v1191_v40 = vld [vmem:[#allocation8 + $0x20] sm:$0xff]  }
  0x71   :  { %996 = vmatpush3.bf16.msra.mxu0 %v1161_v41  ;;  %1018 = vmatpush3.bf16.msra.mxu1 %v1162_v42  ;;  %v1192_v41 = vld [vmem:[#allocation8 + $0x28] sm:$0xff]   ;;  %v1193_v42 = vld [vmem:[#allocation8 + $0x30] sm:$0xff]  }
  0x72   :  { %997 = vmatprep.subr.bf16.mxu0 %v1163_v43  ;;  %1019 = vmatprep.subr.bf16.mxu1 %v1164_v44  ;;  %v1194_v43 = vld [vmem:[#allocation8 + $0x38] sm:$0xff]  }
  0x75   :  { %998 = vmatpush3.bf16.msra.mxu0 %v1165_v45  ;;  %1020 = vmatpush3.bf16.msra.mxu1 %v1166_v46  ;;  %v950_v46 = vld [vmem:[%s1471_s4] ss:$0 sm:$0xff] }
  0x76   :  { %999 = vmatprep.subr.bf16.mxu0 %v1167_v47  ;;  %1021 = vmatprep.subr.bf16.mxu1 %v1168_v48 }
  0x79   :  { %1000 = vmatpush3.bf16.msra.mxu0 %v1169_v49  ;;  %1022 = vmatpush3.bf16.msra.mxu1 %v1170_v50 }
  0x7a   :  { %1001 = vmatprep.subr.bf16.mxu0 %v1171_v51  ;;  %1023 = vmatprep.subr.bf16.mxu1 %v1172_v52 }
  0x7d   :  { %1002 = vmatpush3.bf16.msra.mxu0 %v1173_v53  ;;  %1024 = vmatpush3.bf16.msra.mxu1 %v1174_v54 }
  0x7e   :  { %1003 = vmatprep.subr.bf16.mxu0 %v1175_v55  ;;  %1025 = vmatprep.subr.bf16.mxu1 %v1176_v56 }
  0x81   :  { %1004 = vmatpush3.bf16.msra.mxu0 %v1177_v57  ;;  %1026 = vmatpush3.bf16.msra.mxu1 %v1178_v58 }
  0x82   :  { %1005 = vmatprep.subr.bf16.mxu0 %v1179_v59  ;;  %1027 = vmatprep.subr.bf16.mxu1 %v1180_v60 }
  0x85   :  { %1006 = vmatpush3.bf16.msra.mxu0 %v1181_v61  ;;  %1028 = vmatpush3.bf16.msra.mxu1 %v1182_v62 }
  0x86   :  { %1007 = vmatprep.subr.bf16.mxu0 %v1183_v63  ;;  %1029 = vmatprep.subr.bf16.mxu1 %v1184_v0 }
  0x89   :  { %1008 = vmatpush3.bf16.msra.mxu0 %v1185_v1  ;;  %1030 = vmatpush3.bf16.msra.mxu1 %v1186_v2 }
  0x8a   :  { %1055 = vmatprep.subr.bf16.mxu0 %v1324_v3  ;;  %1075 = vmatprep.subr.bf16.mxu1 %v1324_v3 }
 0x13f   :  { %v334_v15 = vpop.f32.mrb[0].mxu0  ;;  %v375_v16 = vpop.f32.mrb[0].mxu1 }
 0x140   :  { %v335_v17 = vadd.f32 %v334_v15, %v123_v11  ;;  %v376_v18 = vadd.f32 %v375_v16, %v131_v12  ;;  %v336_v19 = vpop.f32.mrb[1].mxu0  ;;  %v377_v20 = vpop.f32.mrb[1].mxu1 }
 0x141   :  { %v337_v21 = vadd.f32 %v336_v19, %v127_v13  ;;  %v378_v22 = vadd.f32 %v377_v20, %v135_v14  ;;  %v338_v23 = vpop.f32.mrb[2].mxu0  ;;  %v379_v24 = vpop.f32.mrb[2].mxu1 }
 0x142   :  { %v382_v25 = vmax.f32 %v335_v17, 0.0  ;;  %v384_v26 = vmax.f32 %v376_v18, 0.0  ;;  %v339_v27 = vpop.f32.mrb[3].mxu0  ;;  %v380_v28 = vpop.f32.mrb[3].mxu1 }
 0x143   :  { %v383_v29 = vmax.f32 %v337_v21, 0.0  ;;  %v385_v30 = vmax.f32 %v378_v22, 0.0 }
 0x144   :  { %v388_v31 = vpack.c.bf16 %v384_v26, %v384_v26  ;;  %v386_v36 = vpack.c.bf16 %v382_v25, %v382_v25 }
 0x145   :  { %v387_v32 = vpack.c.bf16 %v383_v29, %v383_v29  ;;  %v389_v34 = vpack.c.bf16 %v385_v30, %v385_v30 }
 0x147   :  { %685 = vmatprep.mubr.bf16.mxu0 %v387_v32  ;;  %725 = vmatprep.mubr.bf16.mxu1 %v389_v34 }
 0x148   :  { %686 = vmatmul.mubr.bf16.vlgmr.msra.gmra.mrb[4].mxu0 %v386_v36  ;;  %726 = vmatmul.mubr.bf16.vlgmr.msra.gmra.mrb[4].mxu1 %v388_v31 }
 0x149   :  { %1056 = vmatpush3.bf16.msra.mxu0 %v1187_v35  ;;  %1076 = vmatpush3.bf16.msra.mxu1 %v1187_v35 }
 0x14a   :  { %1057 = vmatprep.subr.bf16.mxu0 %v1324_v3  ;;  %1077 = vmatprep.subr.bf16.mxu1 %v1324_v3 }
 0x14b   :  { %1071 = vmatprep.mubr.msk.bf16.mxu0 %vm1325_vm0, %v1324_v3  ;;  %1091 = vmatprep.mubr.msk.bf16.mxu1 %vm1325_vm0, %v1324_v3 }
 0x14d   :  { %1058 = vmatpush3.bf16.msra.mxu0 %v1188_v37  ;;  %1078 = vmatpush3.bf16.msra.mxu1 %v1188_v37 }
 0x14e   :  { %1059 = vmatprep.subr.bf16.mxu0 %v1324_v3  ;;  %1079 = vmatprep.subr.bf16.mxu1 %v1324_v3 }
 0x151   :  { %1060 = vmatpush3.bf16.msra.mxu0 %v1189_v38  ;;  %1080 = vmatpush3.bf16.msra.mxu1 %v1189_v38 }
 0x152   :  { %1061 = vmatprep.subr.bf16.mxu0 %v1324_v3  ;;  %1081 = vmatprep.subr.bf16.mxu1 %v1324_v3 }
 0x155   :  { %1062 = vmatpush3.bf16.msra.mxu0 %v1190_v39  ;;  %1082 = vmatpush3.bf16.msra.mxu1 %v1190_v39 }
 0x156   :  { %1063 = vmatprep.subr.bf16.mxu0 %v1324_v3  ;;  %1083 = vmatprep.subr.bf16.mxu1 %v1324_v3 }
 0x159   :  { %1064 = vmatpush3.bf16.msra.mxu0 %v1191_v40  ;;  %1084 = vmatpush3.bf16.msra.mxu1 %v1191_v40 }
 0x15a   :  { %1065 = vmatprep.subr.bf16.mxu0 %v1324_v3  ;;  %1085 = vmatprep.subr.bf16.mxu1 %v1324_v3 }
 0x15d   :  { %1066 = vmatpush3.bf16.msra.mxu0 %v1192_v41  ;;  %1086 = vmatpush3.bf16.msra.mxu1 %v1192_v41 }
 0x15e   :  { %1067 = vmatprep.subr.bf16.mxu0 %v1324_v3  ;;  %1087 = vmatprep.subr.bf16.mxu1 %v1324_v3 }
 0x161   :  { %1068 = vmatpush3.bf16.msra.mxu0 %v1193_v42  ;;  %1088 = vmatpush3.bf16.msra.mxu1 %v1193_v42 }
 0x162   :  { %1069 = vmatprep.subr.bf16.mxu0 %v1324_v3  ;;  %1089 = vmatprep.subr.bf16.mxu1 %v1324_v3 }
 0x165   :  { %1070 = vmatpush3.bf16.msra.mxu0 %v1194_v43  ;;  %1090 = vmatpush3.bf16.msra.mxu1 %v1194_v43 }
 0x21b   :  { %v1009_v44 = vpop.f32.mrb[4].mxu0  ;;  %v1031_v45 = vpop.f32.mrb[4].mxu1 }
 0x21c   :  { %v1010_v47 = vpop.f32.mrb[5].mxu0  ;;  %v1032_v48 = vpop.f32.mrb[5].mxu1 }
 0x21d   :  { %v1011_v49 = vadd.f32 %v1010_v47, %v1009_v44  ;;  %v1033_v50 = vadd.f32 %v1032_v48, %v1031_v45  ;;  %v1012_v51 = vpop.f32.mrb[6].mxu0  ;;  %v1034_v52 = vpop.f32.mrb[6].mxu1 }
 0x21e   :  { %v1013_v53 = vpop.f32.mrb[7].mxu0  ;;  %v1035_v54 = vpop.f32.mrb[7].mxu1 }
 0x21f   :  { %v688_v55 = vadd.f32 %v1011_v49, %v950_v46 }
 0x221   :  { %v728_v56 = vadd.f32 %v1033_v50, %v688_v55 }
 0x223   :  { %v733_v57 = vadd.f32 %v728_v56, %v1420_v33  ;;  %v991_v33 = vld [vmem:[%s1472_s5] ss:$0 sm:$0xff] }
 0x225   :  { %v734_v58 = vpack.c.bf16 %v733_v57, %v733_v57 }
 0x227   :  { %1072 = vmatmul.mubr.bf16.vlgmr.msra.gmra.mrb[8].mxu0 %v734_v58 }
 0x2fa   :  { %v833_v59 = vpop.f32.mrb[8].mxu0 }
 0x2fb   :  { %v839_v60 = vsub.f32 %v733_v57, %v833_v59  ;;  %v1073_v61 = vpop.f32.mrb[9].mxu0 }
 0x2fc   :  { %v836_v62 = vpop.f32.mrb[10].mxu0 }
 0x2fd   :  { %v840_v63 = vmul.f32 %v839_v60, %v839_v60  ;;  %v1074_v0 = vpop.f32.mrb[11].mxu0 }
 0x2ff   :  { %v841_v1 = vpack.c.bf16 %v840_v63, %v840_v63 }
 0x301   :  { %1092 = vmatmul.mubr.bf16.vlgmr.msra.gmra.mrb[8].mxu1 %v841_v1 }
 0x3d4   :  { %v876_v2 = vpop.f32.mrb[8].mxu1 }
 0x3d5   :  { %v877_v3 = vadd.f32 1e-05, %v876_v2  ;;  %v1093_v4 = vpop.f32.mrb[9].mxu1 }
 0x3d6   :  { %v879_v5 = vpop.f32.mrb[10].mxu1 }
 0x3d7   :  { %1195 = vrsqrt.f32 %v877_v3  ;;  %v1094_v6 = vpop.f32.mrb[11].mxu1 }
 0x3e1   :  { %v1196_v7 = vpop.eup %1195 }
 0x3e2   :  { %v883_v8 = vmul.f32 %v1196_v7, %v839_v60 }
 0x3e4   :  { %v891_v10 = vmul.f32 %v991_v33, %v883_v8 }
 0x3e6   :  { %v899_v11 = vadd.f32 %v992_v9, %v891_v10 }
 0x3e8   :  { %900 = vst [vmem:[#allocation10] sm:$0xf] %v899_v11 }
 0x3e9   :  { %1296 = shalt.err (!%p1293_p8)
}
 0x3ea   :  { %s1297_s0 = scalar_lea.hbm %s1475_s8, 64 }
 0x3eb   :  { %p1298_p9 = scmp.ne.s32.totalorder %s1475_s8, %s1297_s0  ;;  %p1301_p10 = scmp.lt.u32.totalorder %s1297_s0, %s1475_s8 }
 0x3ed   :  { %p1303_p11 = pnand %p1301_p10, %p1298_p9 }
 0x3ef   :  { %1306 = shalt.err (!%p1303_p11)
}
 0x3f0   :  { %910 = dma.vmem_to_hbm [thread:$0]  %s908_s15, 64, %s1475_s8, [#allocation4]  }
 0x3f1   :  { %1313 = dma.done.wait [#allocation4], 64  }
 0x3f2   :  { %1314 = vsyncadd [#allocation4], 4294967232 }
 0x3f3   :  { %914 = vsyncpa [#allocation3], 1 }
 0x3f4   :  { %915 = vsyncpa [#allocation6], 1 }
 0x3f5   :  { %916 = vsyncpa [#allocation9], 1 }
 0x3f6   :  { %917 = vsyncpa [#allocation4], 1 }

</bundles_post_ra>
